<compile_context>
chip_gen: v7x
topology: tpu7x:2x2x1
jax: 0.10.0
libtpu: 0.0.40
codegen_flags: <defaults>
</compile_context>

<pallas_src>
import jax
import jax.numpy as jnp
from jax.experimental import pallas as pl
from jax.experimental.pallas import tpu as pltpu

_LANES = 128


def _bce_sum_kernel(p_ref, y_ref, out_ref):
    """One grid step: (tr, 128) block -> (1, 8, 128) partial sum (positive form)."""
    p = p_ref[...].astype(jnp.float32)
    y = y_ref[...].astype(jnp.float32)

    # PyTorch BCELoss clamps each log term at -100.
    log_p = jnp.maximum(jnp.log(p), -100.0)
    log_1mp = jnp.maximum(jnp.log(1.0 - p), -100.0)
    # Positive form of y*log_p + (1-y)*log_1mp; the negate is hoisted to the
    # wrapper (one negate total instead of one per element).
    term = log_1mp + y * (log_p - log_1mp)

    tr, lanes = term.shape
    # Sublane-only partial reduction: keeps the hot loop as plain VPU adds and
    # the output block lane-dense (unmasked stores). Cross-lane reduce happens
    # once in the wrapper over a tiny array.
    out_ref[...] = term.reshape(tr // 8, 8, lanes).sum(axis=0).reshape(1, 8, lanes)


def _min_sublane_rows(*dtypes):
    # 8 for 32-bit, 16 for 16-bit, 32 for 8-bit (packed sublane layouts).
    return max(max(8, 32 // jnp.dtype(d).itemsize) for d in dtypes)


def _per_step_input_bytes_target():
    """Target bytes of input (both operands, one buffer) moved per grid step."""
    kind = ""
    try:
        kind = jax.devices()[0].device_kind.lower()
    except Exception:
        pass
    if ("v5 lite" in kind) or ("v5e" in kind) or ("v5litepod" in kind):
        # v5e: ~4 MiB/step -> ~8 MiB double-buffered, under the 16 MiB scoped
        # VMEM default with headroom.
        return 4 << 20
    # v6e / v7x / default: ~8 MiB/step -> ~16 MiB double-buffered; well within
    # the 32 MiB scoped default and v7x's 64 MiB physical VMEM.
    return 8 << 20


def bce_loss(y_pred, y_true):
    assert y_pred.shape == y_true.shape
    n = int(y_pred.size)

    p = y_pred.reshape(-1)
    y = y_true.reshape(-1)

    lanes = _LANES
    min_rows = _min_sublane_rows(p.dtype, y.dtype)
    rows_total = n // lanes

    bytes_per_row = lanes * (jnp.dtype(p.dtype).itemsize + jnp.dtype(y.dtype).itemsize)
    target_rows = max(
        min_rows,
        (_per_step_input_bytes_target() // bytes_per_row) // min_rows * min_rows,
    )

    # Choose a tile size tr (multiple of min_rows) and a tile count such that
    # num_tiles * tr <= rows_total: the kernel covers exactly that aligned
    # prefix (no partial blocks, no in-kernel masking).
    if rows_total >= min_rows:
        num_tiles = pl.cdiv(rows_total, target_rows)
        # Prefer >= 2 tiles so the "parallel" grid can shard across both
        # TensorCores on v7x (costs at most one extra ~0.35 us step elsewhere).
        if num_tiles == 1 and rows_total >= 2 * min_rows:
            num_tiles = 2
        tr = max(min_rows, (rows_total // num_tiles // min_rows) * min_rows)
        n_main_rows = num_tiles * tr
        n_main = n_main_rows * lanes
    else:
        num_tiles = 0
        tr = 0
        n_main_rows = 0
        n_main = 0

    total = jnp.zeros((), jnp.float32)

    if n_main > 0:
        if n == rows_total * lanes:
            # Lane-aligned fast path: pure reshape (zero-copy); the kernel only
            # reads the first n_main_rows rows of the array.
            p2 = p.reshape(rows_total, lanes)
            y2 = y.reshape(rows_total, lanes)
        else:
            # Ragged element count: slice the aligned prefix.
            # TODO(synk): avoid this prefix-slice copy with a manual-DMA path.
            p2 = p[:n_main].reshape(n_main_rows, lanes)
            y2 = y[:n_main].reshape(n_main_rows, lanes)

        # 2 inputs x 2 pipeline buffers x tile bytes + output blocks + headroom.
        in_bytes = 2 * tr * bytes_per_row
        out_bytes = 2 * 8 * lanes * 4
        vmem_limit = int(in_bytes + out_bytes + (8 << 20))

        partials = pl.pallas_call(
            _bce_sum_kernel,
            out_shape=jax.ShapeDtypeStruct((num_tiles, 8, lanes), jnp.float32),
            grid_spec=pltpu.PrefetchScalarGridSpec(
                num_scalar_prefetch=0,
                grid=(num_tiles,),
                in_specs=[
                    pl.BlockSpec((tr, lanes), lambda i: (i, 0)),
                    pl.BlockSpec((tr, lanes), lambda i: (i, 0)),
                ],
                out_specs=pl.BlockSpec((1, 8, lanes), lambda i: (i, 0, 0)),
            ),
            compiler_params=pltpu.CompilerParams(
                # Every grid step is independent (per-tile partial sums), so the
                # grid can be sharded across TensorCores on multi-core chips.
                dimension_semantics=("parallel",),
                vmem_limit_bytes=vmem_limit,
            ),
        )(p2, y2)
        total = total + jnp.sum(partials)

    if n_main < n:
        # Small remainder (at most ~num_tiles*min_rows rows plus a sub-row
        # fragment): plain jnp with the same clamped-log formula.
        pt = p[n_main:].astype(jnp.float32)
        yt = y[n_main:].astype(jnp.float32)
        log_p = jnp.maximum(jnp.log(pt), -100.0)
        log_1mp = jnp.maximum(jnp.log(1.0 - pt), -100.0)
        total = total + jnp.sum(log_1mp + yt * (log_p - log_1mp))

    # Single negate + mean, hoisted out of the per-element computation.
    return -total / n


def _bce_reference(y_pred, y_true):
    pf = y_pred.astype(jnp.float32)
    yf = y_true.astype(jnp.float32)
    log_p = jnp.maximum(jnp.log(pf), -100.0)
    log_1mp = jnp.maximum(jnp.log(1.0 - pf), -100.0)
    return jnp.mean(-(yf * log_p + (1.0 - yf) * log_1mp))


if __name__ == "__main__":
    key = jax.random.PRNGKey(0)
    k1, k2, k3, k4, k5, k6, k7, k8 = jax.random.split(key, 8)

    # Primary check: NCHW shape matching the PyTorch module's typical usage.
    B, C, H, W = 2, 4, 16, 16
    logits = jax.random.normal(k1, (B, C, H, W), dtype=jnp.float32)
    y_pred = jax.nn.sigmoid(logits)                       # probabilities in (0, 1)
    y_true = jax.random.bernoulli(k2, 0.5, (B, C, H, W)).astype(jnp.float32)

    loss = jax.block_until_ready(bce_loss(y_pred, y_true))
    ref = jax.block_until_ready(_bce_reference(y_pred, y_true))
    assert jnp.allclose(loss, ref, rtol=1e-5, atol=1e-6), (loss, ref)

    # Ragged element count (exercises the jnp tail path, no padding anywhere).
    shape2 = (2, 3, 7, 5)  # 210 elements, not a multiple of 128
    p2 = jax.nn.sigmoid(jax.random.normal(k3, shape2, dtype=jnp.float32))
    t2 = jax.random.bernoulli(k4, 0.5, shape2).astype(jnp.float32)
    l2 = jax.block_until_ready(bce_loss(p2, t2))
    r2 = jax.block_until_ready(_bce_reference(p2, t2))
    assert jnp.allclose(l2, r2, rtol=1e-4, atol=1e-5), (l2, r2)

    # Lane-aligned but not tile-aligned (kernel main region + jnp tail combine).
    shape3 = (35, 128)  # 4480 elements = 35 rows
    p3 = jax.nn.sigmoid(jax.random.normal(k5, shape3, dtype=jnp.float32))
    t3 = jax.random.bernoulli(k6, 0.5, shape3).astype(jnp.float32)
    l3 = jax.block_until_ready(bce_loss(p3, t3))
    r3 = jax.block_until_ready(_bce_reference(p3, t3))
    assert jnp.allclose(l3, r3, rtol=1e-4, atol=1e-5), (l3, r3)

    # Multiple tiles (exercises the parallel grid / per-tile partial sums).
    shape4 = (4, 4, 128, 128)  # 262144 elements
    p4 = jax.nn.sigmoid(jax.random.normal(k7, shape4, dtype=jnp.float32))
    t4 = jax.random.bernoulli(k8, 0.5, shape4).astype(jnp.float32)
    l4 = jax.block_until_ready(bce_loss(p4, t4))
    r4 = jax.block_until_ready(_bce_reference(p4, t4))
    assert jnp.allclose(l4, r4, rtol=1e-4, atol=1e-5), (l4, r4)

    print("KERNEL_OK")
</pallas_src>

<mosaic_0001>
module attributes {stable_mosaic.version = 11 : i64} {
  func.func @_bce_sum_kernel(%arg0: i32, %arg1: memref<8x128xf32, #tpu.memory_space<vmem>>, %arg2: memref<8x128xf32, #tpu.memory_space<vmem>>, %arg3: memref<1x8x128xf32, #tpu.memory_space<vmem>>) attributes {dimension_semantics = [#tpu.dimension_semantics<parallel>], iteration_bounds = array<i64: 2>, scalar_prefetch = 0 : i64, scratch_operands = 0 : i64, tpu.core_type = #tpu.core_type<tc>, window_params = [{transform_indices = @transform_0, window_bounds = array<i64: 8, 128>}, {transform_indices = @transform_1, window_bounds = array<i64: 8, 128>}, {transform_indices = @transform_2, window_bounds = array<i64: 1, 8, 128>}]} {
    %c0 = arith.constant 0 : index
    %c0_0 = arith.constant 0 : index
    %0 = vector.load %arg1[%c0, %c0_0] : memref<8x128xf32, #tpu.memory_space<vmem>>, vector<8x128xf32>
    %c0_1 = arith.constant 0 : index
    %c0_2 = arith.constant 0 : index
    %1 = vector.load %arg2[%c0_1, %c0_2] : memref<8x128xf32, #tpu.memory_space<vmem>>, vector<8x128xf32>
    %2 = math.log %0 : vector<8x128xf32>
    %cst = arith.constant -1.000000e+02 : f32
    %3 = vector.broadcast %cst : f32 to vector<8x128xf32>
    %4 = arith.maximumf %2, %3 : vector<8x128xf32>
    %cst_3 = arith.constant 1.000000e+00 : f32
    %5 = vector.broadcast %cst_3 : f32 to vector<8x128xf32>
    %6 = arith.subf %5, %0 : vector<8x128xf32>
    %7 = math.log %6 : vector<8x128xf32>
    %cst_4 = arith.constant -1.000000e+02 : f32
    %8 = vector.broadcast %cst_4 : f32 to vector<8x128xf32>
    %9 = arith.maximumf %7, %8 : vector<8x128xf32>
    %10 = arith.subf %4, %9 : vector<8x128xf32>
    %11 = arith.mulf %1, %10 : vector<8x128xf32>
    %12 = arith.addf %9, %11 : vector<8x128xf32>
    %13 = vector.shape_cast %12 : vector<8x128xf32> to vector<1x8x128xf32>
    %cst_5 = arith.constant dense<0.000000e+00> : vector<8x128xf32>
    %14 = vector.multi_reduction <add>, %13, %cst_5 [0] : vector<1x8x128xf32> to vector<8x128xf32>
    %15 = vector.shape_cast %14 : vector<8x128xf32> to vector<1x8x128xf32>
    %c0_6 = arith.constant 0 : index
    %c0_7 = arith.constant 0 : index
    %c0_8 = arith.constant 0 : index
    %16 = vector.load %arg3[%c0_6, %c0_7, %c0_8] : memref<1x8x128xf32, #tpu.memory_space<vmem>>, vector<1x8x128xf32>
    tpu.vector_store %arg3[%c0_6, %c0_7, %c0_8], %15 {strides = array<i32>} : memref<1x8x128xf32, #tpu.memory_space<vmem>>, vector<1x8x128xf32>,
    return
  }
  func.func @transform_0(%arg0: i32) -> (i32, i32) {
    %c0_i32 = arith.constant 0 : i32
    %c0_i32_0 = arith.constant 0 : i32
    return %arg0, %c0_i32 : i32, i32
  }
  func.func @transform_1(%arg0: i32) -> (i32, i32) {
    %c0_i32 = arith.constant 0 : i32
    %c0_i32_0 = arith.constant 0 : i32
    return %arg0, %c0_i32 : i32, i32
  }
  func.func @transform_2(%arg0: i32) -> (i32, i32, i32) {
    %c0_i32 = arith.constant 0 : i32
    %c0_i32_0 = arith.constant 0 : i32
    %c0_i32_1 = arith.constant 0 : i32
    return %arg0, %c0_i32, %c0_i32_0 : i32, i32, i32
  }
}

</mosaic_0001>

<bundles_post_ra>
// kernel: tpu_custom_call.1
= control target key start
LH: loop header
LB: loop body
LE: loop exit
PB: predicated region body
PF: predicated region fallthrough
CT: control target
= control target key end

     0   :  { %7 = vsyncpa [#allocation3], 0  ;;  %s746_s0 = inlined_call_operand.hbm [shape: f32[16,128], index: 0, kind: input, shape index: {}]   ;;  %s747_s1 = inlined_call_operand.hbm [shape: f32[16,128], index: 1, kind: input, shape index: {}]   ;;  %s748_s2 = inlined_call_operand.hbm [shape: f32[2,8,128], index: 2, kind: output, shape index: {}]  }
   0x1   :  { %9 = vsyncpa [#allocation3 + $0x1], 0 }
   0x2   :  { %10 = vsyncpa [#allocation6], 0 }
   0x3   :  { %12 = vsyncpa [#allocation6 + $0x1], 0 }
   0x4   :  { %13 = vsyncpa [#allocation4], 0 }
   0x5   :  { %15 = vsyncpa [#allocation4 + $0x1], 0  ;;  %s537_s9 = smov 0   ;;  %s539_s10 = smov 0  }
   0x6   :  { %s541_s11 = smov 0   ;;  %s543_s12 = smov 0  }
   0x7 LB: > { %s558_s13 = sadd.s32 4294967295, %s517_s12   ;;  %s317_s14 = sadd.s32 4294967294, %s517_s12   ;;  %s517_s12 = sphi %s543_s12, %s767_s12   ;;  %s513_s11 = sphi %s541_s11, %s766_s11   ;;  %s509_s10 = sphi %s539_s10, %s765_s10   ;;  %s505_s9 = sphi %s537_s9, %s764_s9  }
   0x8   : > { %s562_s15 = sadd.s32 1, %s517_s12   ;;  %s28_s16 = sadd.s32 1, %s513_s11 }
   0x9   : > { %s25_s17 = ssub.s32 %s517_s12, %s562_s15  ;;  %p35_p0 = scmp.ne.s32.totalorder %s513_s11, %s509_s10 }
   0xa   : > { %p26_p1 = scmp.eq.s32.totalorder %s25_s17, 0  ;;  %p36_p2 = scmp.eq.s32.totalorder %s517_s12, 0 }
   0xb   : > { %p41_p3 = scmp.ne.s32.totalorder %s509_s10, %s505_s9  ;;  %p42_p4 = scmp.eq.s32.totalorder %s558_s13, 0 }
   0xc   : > { %s574_s18 = scalar_select %p26_p1, %s513_s11, %s28_s16  }
   0xd   : > { %p576_p5 = por %p36_p2, %p35_p0  ;;  %p580_p6 = por %p42_p4, %p41_p3 }
   0xe   : > { %p91_p7 = scmp.eq.s32.totalorder %s558_s13, 1  ;;  %p97_p8 = scmp.eq.s32.totalorder %s317_s14, 1 }
   0xf   : > { %s752_s20 = scalar_select %p580_p6, 1, 0 }
  0x10   : > { %p349_p10 = scmp.lt.s32.totalorder %s517_s12, 2  ;;  %p587_p11 = por %p91_p7, %p35_p0 }
  0x11   : > { %p591_p12 = por %p97_p8, %p41_p3  ;;  %s596_s23 = sand.u32 1, %s513_s11  }
  0x12   : > { %s753_s21 = scalar_select %p587_p11, 1, 0 }
  0x13   : > { %s754_s22 = scalar_select %p591_p12, 1, 0 }
  0x14   : > { %s321_s24 = sshll.u32 %s517_s12, 7  ;;  %s320_s25 = sshll.u32 %s596_s23, 3 }
  0x15   : > { %s605_s28 = scalar_lea.hbm %s746_s0, %s321_s24  ;;  %s121_s29 = scalar_lea.vmem [#allocation2], %s320_s25 }
  0x16   : > { %s128_s30 = sshll.u32 %s121_s29, 4  ;;  %p611_p13 = pnand %p349_p10, %p576_p5  ;;  %s615_s30 = int_to_ptr.vmem [resolvable:$true] %s128_s30 }
  0x17   : > { %s118_s4 = scalar_lea.sflag [#allocation3], %s596_s23  ;;  %s387_s5 = scalar_lea.hbm %s605_s28, 128 }
  0x18   : > { %p388_p2 = scmp.ne.s32.totalorder %s605_s28, %s387_s5  ;;  %p389_p3 = pneg %p611_p13 }
  0x19   : > { %s392_s8 = scalar_lea.hbm %s746_s0, 256  ;;  %p393_p5 = scmp.lt.u32.totalorder %s605_s28, %s746_s0 }
  0x1a   : > { %p390_p4 = pnand %p389_p3, %p388_p2  ;;  %p394_p8 = scmp.lt.u32.totalorder %s392_s8, %s387_s5 }
  0x1b   : > { %p396_p9 = scmp.lt.u32.totalorder %s387_s5, %s605_s28 }
  0x1c   : > { %p391_p7 = pneg %p390_p4  ;;  %p395_p10 = por %p394_p8, %p393_p5 }
  0x1e   : > { %p397_p0 = por %p396_p9, %p395_p10 }
  0x20   : > { %p398_p1 = pnand %p397_p0, %p391_p7 }
  0x22   : > { %401 = shalt.err (!%p398_p1)
}
  0x23   : > { %s402_s17 = scalar_lea.vmem %s615_s30, 128  ;;  %s519_s19 = smov [#allocation2]  }
  0x24   : > { %p403_p2 = scmp.ne.s32.totalorder %s615_s30, %s402_s17  ;;  %s407_s26 = sshll.u32 %s519_s19, 4  ;;  %s408_s26 = int_to_ptr.vmem [resolvable:$false] %s407_s26 }
  0x25   : > { %s409_s27 = scalar_lea.vmem %s408_s26, 256  ;;  %p410_p11 = scmp.lt.s32.totalorder %s615_s30, %s408_s26 }
  0x26   : > { %p405_p4 = pnand %p403_p2, %p389_p3  ;;  %p411_p5 = scmp.lt.s32.totalorder %s409_s27, %s402_s17 }
  0x28   : > { %p406_p12 = pneg %p405_p4  ;;  %p412_p8 = por %p411_p5, %p410_p11 }
  0x2a   : > { %p413_p9 = pnand %p412_p8, %p406_p12 }
  0x2c   : > { %416 = shalt.err (!%p413_p9)
}
  0x2d   : > { %341 = dma.hbm_to_vmem [thread:$0]  (!%p611_p13), %s605_s28, 128, %s615_s30, %s118_s4  }
  0x2e   : > { %p756_p0 = scmp.lt.s32.totalorder %s517_s12, 3  ;;  %p757_p1 = scmp.ge.s32.totalorder %s517_s12, 1 }
  0x2f   : > { %s658_s7 = scalar_lea.hbm %s747_s1, %s321_s24  ;;  %s139_s8 = scalar_lea.vmem [#allocation5], %s320_s25 }
  0x30   : > { %p649_p7 = pnand %p757_p1, %p756_p0  ;;  %s146_s14 = sshll.u32 %s139_s8, 4  ;;  %s147_s14 = int_to_ptr.vmem [resolvable:$true] %s146_s14 }
  0x31   : > { %s136_s28 = scalar_lea.sflag [#allocation6], %s596_s23  ;;  %s417_s30 = scalar_lea.hbm %s658_s7, 128 }
  0x32   : > { %s758_s29 = scalar_select %p649_p7, 1, 0 }
  0x33   : > { %p418_p11 = scmp.ne.s32.totalorder %s658_s7, %s417_s30  ;;  %s422_s24 = scalar_lea.hbm %s747_s1, 256 }
  0x34   : > { %p423_p2 = scmp.lt.u32.totalorder %s658_s7, %s747_s1  ;;  %p424_p4 = scmp.lt.u32.totalorder %s422_s24, %s417_s30 }
  0x35   : > { %p420_p12 = pnand %p418_p11, %p389_p3  ;;  %p426_p8 = scmp.lt.u32.totalorder %s417_s30, %s658_s7 }
  0x36   : > { %p425_p5 = por %p424_p4, %p423_p2 }
  0x37   : > { %p421_p10 = pneg %p420_p12 }
  0x38   : > { %p427_p9 = por %p426_p8, %p425_p5 }
  0x3a   : > { %p428_p0 = pnand %p427_p9, %p421_p10 }
  0x3c   : > { %431 = shalt.err (!%p428_p0)
}
  0x3d   : > { %s432_s23 = scalar_lea.vmem %s147_s14, 128  ;;  %s520_s25 = smov [#allocation5]  }
  0x3e   : > { %p433_p1 = scmp.ne.s32.totalorder %s147_s14, %s432_s23  ;;  %s437_s26 = sshll.u32 %s520_s25, 4  ;;  %s438_s26 = int_to_ptr.vmem [resolvable:$false] %s437_s26 }
  0x3f   : > { %s439_s27 = scalar_lea.vmem %s438_s26, 256  ;;  %p440_p6 = scmp.lt.s32.totalorder %s147_s14, %s438_s26 }
  0x40   : > { %p435_p11 = pnand %p433_p1, %p389_p3  ;;  %p441_p7 = scmp.lt.s32.totalorder %s439_s27, %s432_s23 }
  0x42   : > { %p436_p12 = pneg %p435_p11  ;;  %p442_p2 = por %p441_p7, %p440_p6 }
  0x44   : > { %p443_p4 = pnand %p442_p2, %p436_p12 }
  0x46   : > { %446 = shalt.err (!%p443_p4)
}
  0x47   : > { %344 = dma.hbm_to_vmem [thread:$0]  (!%p611_p13), %s658_s7, 128, %s147_s14, %s136_s28  }
  0x48   : > { %p759_p10 = scmp.ne.s32.totalorder %s758_s29, 0 }
  0x49   : > { %s685_s5 = sand.u32 (!%p759_p10), 1, %s509_s10   ;;  %p760_p3 = scmp.ne.s32.totalorder (!%p759_p10), %s752_s20, 0 }
  0x4a   : > { %155 = sbr.rel (%p759_p10) target bundleno = 122 (0x7a), region = 28  ;;  %s325_s6 = sshll.u32 (!%p759_p10), %s685_s5, 3 }
  0x4b   : > { %s158_s8 = scalar_lea.sflag (!%p759_p10), [#allocation3], %s685_s5  ;;  %s161_s30 = scalar_lea.vmem (!%p759_p10), [#allocation2], %s325_s6 }
  0x51   : > { %492 = dma.done.wait (%p760_p3), %s158_s8, 128  }
  0x52   : > { %494 = vsyncadd (%p760_p3), %s158_s8, 4294967168  ;;  %s167_s3 = scalar_lea.sflag [#allocation6], %s685_s5  ;;  %s170_s7 = scalar_lea.vmem [#allocation5], %s325_s6 }
  0x53   : > { %496 = dma.done.wait (%p760_p3), %s167_s3, 128  }
  0x54   : > { %498 = vsyncadd (%p760_p3), %s167_s3, 4294967168  ;;  %v196_v0 = vld [vmem:[%s161_s30] sm:$0xff]  ;;  %v197_v8 = vld [vmem:[%s170_s7] sm:$0xff]  ;;  %s195_s29 = scalar_lea.vmem [#allocation7], %s325_s6  ;;  %s329_s28 = sshll.u32 %s558_s13, 7 }
  0x55   : > { %383 = vlog2.f32 %v196_v0  ;;  %v201_v1 = vsub.f32 1.0, %v196_v0  ;;  %s224_s14 = sshll.u32 %s195_s29, 4  ;;  %s704_s16 = scalar_lea.hbm %s748_s2, %s329_s28  ;;  %s699_s14 = int_to_ptr.vmem [resolvable:$true] %s224_s14 }
  0x56   : > { %s211_s24 = scalar_lea.sflag [#allocation4], %s685_s5  ;;  %s447_s17 = scalar_lea.vmem %s699_s14, 128 }
  0x57   : > { %385 = vlog2.f32 %v201_v1  ;;  %p448_p6 = scmp.ne.s32.totalorder %s699_s14, %s447_s17  ;;  %p761_p13 = scmp.ne.s32.totalorder %s753_s21, 0 }
  0x58   : > { %s521_s13 = smov [#allocation7]  }
  0x59   : > { %p449_p7 = pnand %p448_p6, %p761_p13  ;;  %s451_s19 = sshll.u32 %s521_s13, 4  ;;  %s452_s19 = int_to_ptr.vmem [resolvable:$false] %s451_s19 }
  0x5a   : > { %s453_s23 = scalar_lea.vmem %s452_s19, 256  ;;  %p454_p8 = scmp.lt.s32.totalorder %s699_s14, %s452_s19 }
  0x5b   : > { %p450_p5 = pneg %p449_p7  ;;  %p455_p9 = scmp.lt.s32.totalorder %s453_s23, %s447_s17 }
  0x5d   : > { %p456_p0 = por %p455_p9, %p454_p8 }
  0x5f   : > { %v384_v2 = vpop.eup %383  ;;  %p457_p1 = pnand %p456_p0, %p450_p5 }
  0x60   : > { %v199_v3 = vmul.f32 0.6931472, %v384_v2 }
  0x61   : > { %v386_v4 = vpop.eup %385 }
  0x62   : > { %v200_v5 = vmax.f32 %v199_v3, -100.0  ;;  %v203_v6 = vmul.f32 0.6931472, %v386_v4 }
  0x64   : > { %v204_v7 = vmax.f32 %v203_v6, -100.0 }
  0x66   : > { %v205_v9 = vsub.f32 %v200_v5, %v204_v7 }
  0x68   : > { %v206_v10 = vmul.f32 %v205_v9, %v197_v8 }
  0x6a   : > { %v207_v11 = vadd.f32 %v206_v10, %v204_v7 }
  0x6c   : > { %209 = vst [vmem:[%s195_s29] sm:$0xff] %v207_v11 }
  0x6d   : > { %460 = shalt.err (!%p457_p1)
}
  0x6e   : > { %s461_s25 = scalar_lea.hbm %s704_s16, 128  ;;  %s465_s5 = scalar_lea.hbm %s748_s2, 256 }
  0x6f   : > { %p462_p11 = scmp.ne.s32.totalorder %s704_s16, %s461_s25  ;;  %p466_p4 = scmp.lt.u32.totalorder %s704_s16, %s748_s2 }
  0x70   : > { %p467_p10 = scmp.lt.u32.totalorder %s465_s5, %s461_s25  ;;  %p469_p6 = scmp.lt.u32.totalorder %s461_s25, %s704_s16 }
  0x71   : > { %p463_p12 = pnand %p462_p11, %p761_p13 }
  0x72   : > { %p468_p3 = por %p467_p10, %p466_p4 }
  0x73   : > { %p464_p2 = pneg %p463_p12 }
  0x74   : > { %p470_p7 = por %p469_p6, %p468_p3 }
  0x76   : > { %p471_p5 = pnand %p470_p7, %p464_p2 }
  0x78   : > { %474 = shalt.err (!%p471_p5)
}
  0x79   : > { %336 = dma.vmem_to_hbm [thread:$0]  (%p761_p13), %s699_s14, 128, %s704_s16, %s211_s24  }
  0x7a PF: > { %s236_s30 = sand.u32 1, %s505_s9   ;;  %p762_p8 = scmp.ne.s32.totalorder %s754_s22, 0 }
  0x7b   : > { %p763_p9 = scmp.ge.s32.totalorder %s517_s12, 2  ;;  %s237_s3 = scalar_lea.sflag [#allocation4], %s236_s30 }
  0x7d   : > { %p346_p0 = pnand %p763_p9, %p762_p8 }
  0x7f   : > { %500 = dma.done.wait (!%p346_p0), %s237_s3, 128  }
  0x80   : > { %502 = vsyncadd (!%p346_p0), %s237_s3, 4294967168  ;;  %p18_p1 = scmp.ge.s32.totalorder %s562_s15, 4   ;;  %s764_s9 = smov %s509_s10 }
  0x81   : > { %s765_s10 = smov %s513_s11  ;;  %s766_s11 = smov %s574_s18 }
  0x82   : > { %s767_s12 = smov %s562_s15  ;;  %20 = sbr.rel (!%p18_p1) target bundleno = 7 (0x7), region = 86 }
  0x89   :  { %242 = vsyncpa [#allocation3], 1 }
  0x8a   :  { %244 = vsyncpa [#allocation3 + $0x1], 1 }
  0x8b   :  { %245 = vsyncpa [#allocation6], 1 }
  0x8c   :  { %247 = vsyncpa [#allocation6 + $0x1], 1 }
  0x8d   :  { %248 = vsyncpa [#allocation4], 1 }
  0x8e   :  { %250 = vsyncpa [#allocation4 + $0x1], 1 }

</bundles_post_ra>
